<compile_context>
chip_gen: v7x
topology: tpu7x:2x2x1
jax: 0.10.0
libtpu: 0.0.40
codegen_flags: <defaults>
</compile_context>

<pallas_src>
import functools

import jax
import jax.numpy as jnp
from jax.experimental import pallas as pl
from jax.experimental.pallas import tpu as pltpu


_LANES = 128
# (4096, 128) f32 block = 2 MiB -> (in + out) x 2 buffers = 8 MiB VMEM.
_MAX_TILE_ROWS = 4096


# ---------------------------------------------------------------------------
# Kernels
# ---------------------------------------------------------------------------
def _quant_round_kernel(x_ref, o_ref, *, scale):
    # y = round(x * scale) / scale   (jnp.round == torch.round: half-to-even)
    # Compute in f32 so bf16 inputs don't lose the low decimal digits.
    x = x_ref[...].astype(jnp.float32)
    o_ref[...] = (jnp.round(x * scale) / scale).astype(o_ref.dtype)


def _quant_sign_kernel(x_ref, o_ref):
    # y = sign(x); sign(0) (and -0.0) -> +1, via a single compare + select.
    x = x_ref[...]
    one = jnp.ones((), dtype=o_ref.dtype)
    o_ref[...] = jnp.where(x >= 0, one, -one)


# ---------------------------------------------------------------------------
# Wrapper
# ---------------------------------------------------------------------------
@functools.partial(jax.jit, static_argnames=("npoints",))
def quantizer_forward(x: jax.Array, npoints: int = 3) -> jax.Array:
    """Pallas equivalent of Quantizer(npoints).forward(x)."""
    orig_shape = x.shape

    flat = x.reshape(-1)
    n = flat.shape[0]

    # Pad only if the element count is not already lane-aligned (128).
    n_pad = pl.cdiv(n, _LANES) * _LANES
    if n_pad != n:
        flat = jnp.pad(flat, (0, n_pad - n))
    rows = n_pad // _LANES
    slab = flat.reshape(rows, _LANES)

    if rows <= _MAX_TILE_ROWS:
        tile_rows = rows            # single full-array block (always legal)
    else:
        tile_rows = _MAX_TILE_ROWS  # multiple of 8; last block clamped by Pallas
    grid = (pl.cdiv(rows, tile_rows),)

    if npoints < 0:
        kernel = _quant_sign_kernel
    else:
        kernel = functools.partial(_quant_round_kernel,
                                   scale=float(10 ** npoints))

    out = pl.pallas_call(
        kernel,
        out_shape=jax.ShapeDtypeStruct((rows, _LANES), slab.dtype),
        grid=grid,
        in_specs=[pl.BlockSpec((tile_rows, _LANES), lambda i: (i, 0))],
        out_specs=pl.BlockSpec((tile_rows, _LANES), lambda i: (i, 0)),
        compiler_params=pltpu.CompilerParams(
            dimension_semantics=("parallel",)
        ),
    )(slab)

    out = out.reshape(-1)
    if n_pad != n:
        out = out[:n]
    return out.reshape(orig_shape)


# ---------------------------------------------------------------------------
# Main
# ---------------------------------------------------------------------------
if __name__ == "__main__":
    key = jax.random.PRNGKey(0)
    # NCHW input, small shapes consistent with a conv-style module.
    x = jax.random.normal(key, (2, 4, 16, 16), dtype=jnp.float32)

    npoints = 3  # module default
    y = jax.block_until_ready(quantizer_forward(x, npoints=npoints))

    # Reference check in plain JAX (same semantics as the PyTorch forward).
    scale = 10.0 ** npoints
    y_ref = jnp.round(x * scale) / scale
    assert y.shape == x.shape and y.dtype == x.dtype
    assert jnp.allclose(y, y_ref, atol=1e-6), "round branch mismatch"

    # Also exercise the npoints < 0 (sign) branch once.
    y_sign = jax.block_until_ready(quantizer_forward(x, npoints=-1))
    s_ref = jnp.sign(x)
    s_ref = jnp.where(s_ref == 0, jnp.ones_like(s_ref), s_ref)
    assert jnp.allclose(y_sign, s_ref), "sign branch mismatch"

    print("KERNEL_OK")
</pallas_src>

<mosaic_0001>
module attributes {stable_mosaic.version = 11 : i64} {
  func.func @_quant_round_kernel(%arg0: i32, %arg1: memref<16x128xf32, #tpu.memory_space<vmem>>, %arg2: memref<16x128xf32, #tpu.memory_space<vmem>>) attributes {dimension_semantics = [#tpu.dimension_semantics<parallel>], iteration_bounds = array<i64: 1>, scalar_prefetch = 0 : i64, scratch_operands = 0 : i64, tpu.core_type = #tpu.core_type<tc>, window_params = [{transform_indices = @transform_0, window_bounds = array<i64: 16, 128>}, {transform_indices = @transform_1, window_bounds = array<i64: 16, 128>}]} {
    %c0 = arith.constant 0 : index
    %c0_0 = arith.constant 0 : index
    %0 = vector.load %arg1[%c0, %c0_0] : memref<16x128xf32, #tpu.memory_space<vmem>>, vector<16x128xf32>
    %cst = arith.constant 1.000000e+03 : f32
    %1 = vector.broadcast %cst : f32 to vector<16x128xf32>
    %2 = arith.mulf %0, %1 : vector<16x128xf32>
    %3 = math.roundeven %2 : vector<16x128xf32>
    %cst_1 = arith.constant 1.000000e+03 : f32
    %4 = vector.broadcast %cst_1 : f32 to vector<16x128xf32>
    %5 = arith.divf %3, %4 : vector<16x128xf32>
    %c0_2 = arith.constant 0 : index
    %c0_3 = arith.constant 0 : index
    %6 = vector.load %arg2[%c0_2, %c0_3] : memref<16x128xf32, #tpu.memory_space<vmem>>, vector<16x128xf32>
    tpu.vector_store %arg2[%c0_2, %c0_3], %5 {strides = array<i32>} : memref<16x128xf32, #tpu.memory_space<vmem>>, vector<16x128xf32>,
    return
  }
  func.func @transform_0(%arg0: i32) -> (i32, i32) {
    %c0_i32 = arith.constant 0 : i32
    %c0_i32_0 = arith.constant 0 : i32
    return %arg0, %c0_i32 : i32, i32
  }
  func.func @transform_1(%arg0: i32) -> (i32, i32) {
    %c0_i32 = arith.constant 0 : i32
    %c0_i32_0 = arith.constant 0 : i32
    return %arg0, %c0_i32 : i32, i32
  }
}

</mosaic_0001>

<bundles_post_ra>
// kernel: quantizer_forward.1
= control target key start
LH: loop header
LB: loop body
LE: loop exit
PB: predicated region body
PF: predicated region fallthrough
CT: control target
= control target key end

     0   :  { %s47_s0 = inlined_call_operand.vmem [shape: f32[16,128], index: 0, kind: input, shape index: {}]   ;;  %s48_s1 = inlined_call_operand.vmem [shape: f32[16,128], index: 1, kind: output, shape index: {}]  }
   0x1   :  { %v8_v0 = vld [vmem:[%s47_s0] sm:$0xff]  ;;  %v9_v1 = vld [vmem:[%s47_s0 + $0x8] sm:$0xff] }
   0x2   :  { %v10_v2 = vmul.f32 1000.0, %v8_v0  ;;  %v11_v3 = vmul.f32 1000.0, %v9_v1 }
   0x4   :  { %v23_v4 = vround.rtne.f32 %v10_v2  ;;  %v24_v5 = vround.rtne.f32 %v11_v3 }
   0x6   :  { %v15_v6 = vmul.f32 0.001, %v23_v4  ;;  %v16_v7 = vmul.f32 0.001, %v24_v5 }
   0x8   :  { %17 = vst [vmem:[%s48_s1] sm:$0xff] %v15_v6  ;;  %18 = vst [vmem:[%s48_s1 + $0x8] sm:$0xff] %v16_v7 }

</bundles_post_ra>
